<compile_context>
chip_gen: v7x
topology: tpu7x:2x2x1
jax: 0.10.0
libtpu: 0.0.40
codegen_flags: <defaults>
</compile_context>

<pallas_src>
import jax
import jax.numpy as jnp
from jax import lax
from jax.experimental import pallas as pl
from jax.experimental.pallas import tpu as pltpu

# ---- problem config: ConvBlock(in_channels=4, out_channels=8, kernel_size=3,
#      stride=1, padding=1) at N=2, H=W=16 ----
N, C_IN, H, W = 2, 4, 16, 16
C_OUT, KH, KW = 8, 3, 3
STRIDE, PAD = 1, 1
BN_EPS = 1e-5
LRELU_SLOPE = 0.1

K = KH * KW * C_IN            # 36  (im2col contraction dim)
KP = 40                       # K zero-padded to next multiple of 8 (NOT 128)
M = N * H * W                 # 512 (lane-dense output dim)


def convblock_kernel(xT_ref, wab_ref, o_ref):
    """Fused conv (single im2col matmul) + batch-norm (batch stats) + leaky-relu.

    xT_ref : (KP, M)          f32, VMEM -- im2col'd input, transposed, K-padded
    wab_ref: (C_OUT, KP + 2)  f32, VMEM -- [W' | gamma | beta] packed columns
    o_ref  : (C_OUT, M)       f32, VMEM -- y^T, lane-dense
    """
    w = wab_ref[:, :KP]               # (C_OUT, KP)
    gamma = wab_ref[:, KP:KP + 1]     # (C_OUT, 1)
    beta = wab_ref[:, KP + 1:KP + 2]  # (C_OUT, 1)

    # One MXU matmul: (C_OUT, KP) @ (KP, M) -> (C_OUT, M).
    acc = jnp.dot(w, xT_ref[...], preferred_element_type=jnp.float32)

    # NOTE: conv bias intentionally omitted -- a per-channel constant before
    # train-mode BatchNorm is cancelled exactly by the mean subtraction.

    # BatchNorm2d (training mode): biased batch stats per output channel,
    # computed as lane reductions over 4 dense vregs.
    mean = jnp.mean(acc, axis=-1, keepdims=True)                  # (C_OUT, 1)
    centered = acc - mean
    var = jnp.mean(centered * centered, axis=-1, keepdims=True)   # (C_OUT, 1)
    inv_std = lax.rsqrt(var + BN_EPS)
    y = centered * (inv_std * gamma) + beta

    # LeakyReLU(0.1): single vmax per vreg (bit-identical to where() for 0<slope<1).
    o_ref[...] = jnp.maximum(y, LRELU_SLOPE * y)


def conv_block(x_nchw, w_oihw, bias, gamma, beta):
    """x_nchw: (N, C_IN, H, W). Returns (N, C_OUT, H, W), matching PyTorch ConvBlock."""
    del bias  # cancelled by train-mode BatchNorm (see kernel comment)

    # ---- layout plumbing (wrapper-side im2col; fused into the pallas_call
    #      operand via allow_input_fusion so xT never hits HBM) ----
    x_cnhw = jnp.transpose(x_nchw, (1, 0, 2, 3)).astype(jnp.float32)   # (C_IN, N, H, W)
    xp = jnp.pad(x_cnhw, ((0, 0), (0, 0), (PAD, PAD), (PAD, PAD)))     # (C_IN, N, H+2, W+2)

    # Rows indexed by (kh, kw, cin); columns by (n, h, w).
    taps = [xp[:, :, kh:kh + H:STRIDE, kw:kw + W:STRIDE]               # (C_IN, N, H, W)
            for kh in range(KH) for kw in range(KW)]
    xT = jnp.stack(taps, axis=0).reshape(K, M)                         # (36, 512)
    xT = jnp.pad(xT, ((0, KP - K), (0, 0)))                            # (40, 512) zero rows

    # PyTorch conv weight (C_OUT, C_IN, KH, KW) -> (C_OUT, K) matching the
    # (kh, kw, cin) row order of xT, zero-padded to KP, with gamma/beta packed
    # as two extra columns so the kernel has a single parameter operand.
    wT = jnp.transpose(w_oihw, (0, 2, 3, 1)).reshape(C_OUT, K).astype(jnp.float32)
    wab = jnp.concatenate(
        [wT,
         jnp.zeros((C_OUT, KP - K), jnp.float32),
         gamma.reshape(C_OUT, 1).astype(jnp.float32),
         beta.reshape(C_OUT, 1).astype(jnp.float32)],
        axis=1)                                                        # (8, 42)

    cost = pl.CostEstimate(
        flops=2 * C_OUT * KP * M,
        transcendentals=C_OUT,  # rsqrt per channel
        bytes_accessed=4 * (KP * M + C_OUT * (KP + 2) + C_OUT * M),
    )

    outT = pl.pallas_call(
        convblock_kernel,
        out_shape=jax.ShapeDtypeStruct((C_OUT, M), jnp.float32),
        in_specs=[pl.BlockSpec(memory_space=pltpu.MemorySpace.VMEM)] * 2,
        out_specs=pl.BlockSpec(memory_space=pltpu.MemorySpace.VMEM),
        compiler_params=pltpu.CompilerParams(
            # Fuse the im2col producer chain of xT into the pallas input so the
            # 9x-inflated patch matrix is not materialized in HBM.
            allow_input_fusion=[True, False]),
        cost_estimate=cost,
    )(xT, wab)

    # (C_OUT, N*H*W) -> (C_OUT, N, H, W) -> NCHW (kept for PyTorch layout parity;
    # drop if the downstream consumer accepts channel-first-of-batch layout).
    out = outT.reshape(C_OUT, N, H, W)
    return jnp.transpose(out, (1, 0, 2, 3))


def reference(x_nchw, w_oihw, bias, gamma, beta):
    """Pure-JAX reference mirroring PyTorch Conv2d + BatchNorm2d(train) + LeakyReLU."""
    y = lax.conv_general_dilated(
        x_nchw.astype(jnp.float32), w_oihw.astype(jnp.float32),
        window_strides=(STRIDE, STRIDE), padding=((PAD, PAD), (PAD, PAD)),
        dimension_numbers=("NCHW", "OIHW", "NCHW"))
    y = y + bias.reshape(1, C_OUT, 1, 1)
    mean = jnp.mean(y, axis=(0, 2, 3), keepdims=True)
    var = jnp.mean((y - mean) ** 2, axis=(0, 2, 3), keepdims=True)
    y = (y - mean) * lax.rsqrt(var + BN_EPS)
    y = y * gamma.reshape(1, C_OUT, 1, 1) + beta.reshape(1, C_OUT, 1, 1)
    return jnp.where(y > 0, y, LRELU_SLOPE * y)


if __name__ == "__main__":
    key = jax.random.PRNGKey(0)
    kx, kw, kb = jax.random.split(key, 3)

    x = jax.random.normal(kx, (N, C_IN, H, W), dtype=jnp.float32)

    # Deterministic parameter init (PyTorch-like fan_in scaling for conv; BN defaults).
    fan_in = C_IN * KH * KW
    bound = 1.0 / (fan_in ** 0.5)
    w = jax.random.uniform(kw, (C_OUT, C_IN, KH, KW), minval=-bound, maxval=bound,
                           dtype=jnp.float32)
    b = jax.random.uniform(kb, (C_OUT,), minval=-bound, maxval=bound, dtype=jnp.float32)
    gamma = jnp.ones((C_OUT,), dtype=jnp.float32)   # BatchNorm2d weight default
    beta = jnp.zeros((C_OUT,), dtype=jnp.float32)   # BatchNorm2d bias default

    out = jax.block_until_ready(conv_block(x, w, b, gamma, beta))
    ref = jax.block_until_ready(reference(x, w, b, gamma, beta))

    assert out.shape == (N, C_OUT, H, W)
    assert jnp.allclose(out, ref, atol=1e-4, rtol=1e-4), \
        f"max abs err {jnp.max(jnp.abs(out - ref))}"

    print("KERNEL_OK")
</pallas_src>

<mosaic_0001>
module attributes {stable_mosaic.version = 11 : i64} {
  func.func @convblock_kernel(%arg0: memref<40x512xf32, #tpu.memory_space<vmem>>, %arg1: memref<8x42xf32, #tpu.memory_space<vmem>>, %arg2: memref<8x512xf32, #tpu.memory_space<vmem>>) attributes {dimension_semantics = [], scalar_prefetch = 0 : i64, scratch_operands = 0 : i64, tpu.core_type = #tpu.core_type<tc>} {
    %c0 = arith.constant 0 : index
    %c0_0 = arith.constant 0 : index
    %0 = vector.load %arg1[%c0, %c0_0] : memref<8x42xf32, #tpu.memory_space<vmem>>, vector<8x40xf32>
    %c0_1 = arith.constant 0 : index
    %c40 = arith.constant 40 : index
    %1 = vector.load %arg1[%c0_1, %c40] : memref<8x42xf32, #tpu.memory_space<vmem>>, vector<8x1xf32>
    %c0_2 = arith.constant 0 : index
    %c41 = arith.constant 41 : index
    %2 = vector.load %arg1[%c0_2, %c41] : memref<8x42xf32, #tpu.memory_space<vmem>>, vector<8x1xf32>
    %c0_3 = arith.constant 0 : index
    %c0_4 = arith.constant 0 : index
    %3 = vector.load %arg0[%c0_3, %c0_4] : memref<40x512xf32, #tpu.memory_space<vmem>>, vector<40x512xf32>
    %cst = arith.constant dense<0.000000e+00> : vector<8x512xf32>
    %4 = tpu.matmul %0, %3, %cst {dimension_numbers = #tpu.dot_dimension_numbers<[1], [0], [0], [1], [0, 0, 1, 1], [], []>} : vector<8x40xf32>, vector<40x512xf32>, vector<8x512xf32> -> vector<8x512xf32>
    %cst_5 = arith.constant dense<0.000000e+00> : vector<8xf32>
    %5 = vector.multi_reduction <add>, %4, %cst_5 [1] : vector<8x512xf32> to vector<8xf32>
    %6 = vector.shape_cast %5 : vector<8xf32> to vector<8x1xf32>
    %cst_6 = arith.constant 5.120000e+02 : f32
    %7 = vector.broadcast %cst_6 : f32 to vector<8x1xf32>
    %8 = arith.divf %6, %7 : vector<8x1xf32>
    %9 = vector.broadcast %8 : vector<8x1xf32> to vector<8x512xf32>
    %10 = arith.subf %4, %9 : vector<8x512xf32>
    %11 = arith.mulf %10, %10 : vector<8x512xf32>
    %cst_7 = arith.constant dense<0.000000e+00> : vector<8xf32>
    %12 = vector.multi_reduction <add>, %11, %cst_7 [1] : vector<8x512xf32> to vector<8xf32>
    %13 = vector.shape_cast %12 : vector<8xf32> to vector<8x1xf32>
    %cst_8 = arith.constant 5.120000e+02 : f32
    %14 = vector.broadcast %cst_8 : f32 to vector<8x1xf32>
    %15 = arith.divf %13, %14 : vector<8x1xf32>
    %cst_9 = arith.constant 9.99999974E-6 : f32
    %16 = vector.broadcast %cst_9 : f32 to vector<8x1xf32>
    %17 = arith.addf %15, %16 : vector<8x1xf32>
    %18 = math.rsqrt %17 : vector<8x1xf32>
    %19 = arith.mulf %18, %1 : vector<8x1xf32>
    %20 = vector.broadcast %19 : vector<8x1xf32> to vector<8x512xf32>
    %21 = arith.mulf %10, %20 : vector<8x512xf32>
    %22 = vector.broadcast %2 : vector<8x1xf32> to vector<8x512xf32>
    %23 = arith.addf %21, %22 : vector<8x512xf32>
    %cst_10 = arith.constant 1.000000e-01 : f32
    %24 = vector.broadcast %cst_10 : f32 to vector<8x512xf32>
    %25 = arith.mulf %24, %23 : vector<8x512xf32>
    %26 = arith.maximumf %23, %25 : vector<8x512xf32>
    %c0_11 = arith.constant 0 : index
    %c0_12 = arith.constant 0 : index
    %27 = vector.load %arg2[%c0_11, %c0_12] : memref<8x512xf32, #tpu.memory_space<vmem>>, vector<8x512xf32>
    tpu.vector_store %arg2[%c0_11, %c0_12], %26 {strides = array<i32>} : memref<8x512xf32, #tpu.memory_space<vmem>>, vector<8x512xf32>,
    return
  }
}

</mosaic_0001>

<bundles_post_ra>
// kernel: tpu_custom_call.1
= control target key start
LH: loop header
LB: loop body
LE: loop exit
PB: predicated region body
PF: predicated region fallthrough
CT: control target
= control target key end

     0   :  { %7 = vsyncpa [#allocation3], 0  ;;  %s436_s0 = inlined_call_operand.hbm [shape: f32[40,512], index: 0, kind: input, shape index: {}]   ;;  %s437_s1 = inlined_call_operand.hbm [shape: f32[8,42], index: 1, kind: input, shape index: {}]   ;;  %s438_s2 = inlined_call_operand.hbm [shape: f32[8,512], index: 2, kind: output, shape index: {}]  }
   0x1   :  { %8 = vsyncpa [#allocation6], 0 }
   0x2   :  { %9 = vsyncpa [#allocation4], 0  ;;  %s377_s9 = smov [#allocation2]   ;;  %s305_s13 = scalar_lea.hbm %s436_s0, 2560 }
   0x3   :  { %s15_s10 = sshll.u32 %s377_s9, 4  ;;  %p306_p0 = scmp.ne.s32.totalorder %s436_s0, %s305_s13  ;;  %s16_s10 = int_to_ptr.vmem [resolvable:$true] %s15_s10 }
   0x4   :  { %p309_p1 = scmp.lt.u32.totalorder %s305_s13, %s436_s0 }
   0x6   :  { %p311_p2 = pnand %p309_p1, %p306_p0 }
   0x8   :  { %314 = shalt.err (!%p311_p2)
}
   0x9   :  { %s315_s18 = scalar_lea.vmem %s16_s10, 2560  ;;  %p320_p4 = scmp.lt.s32.totalorder %s16_s10, %s16_s10 }
   0xa   :  { %p316_p3 = scmp.ne.s32.totalorder %s16_s10, %s315_s18  ;;  %p321_p5 = scmp.lt.s32.totalorder %s315_s18, %s315_s18 }
   0xc   :  { %p322_p6 = por %p321_p5, %p320_p4 }
   0xe   :  { %p323_p7 = pnand %p322_p6, %p316_p3 }
  0x10   :  { %326 = shalt.err (!%p323_p7)
}
  0x11   :  { %s378_s19 = smov 512   ;;  %s379_s20 = smov 32  }
  0x12   :  { %21 = dma.hbm_to_vmem [thread:$0]  %s436_s0, 2560, %s16_s10, [#allocation3], %s378_s19, %s378_s19, %s379_s20  }
  0x13   :  { %s380_s23 = smov [#allocation5]   ;;  %s327_s27 = scalar_lea.hbm %s437_s1, 128 }
  0x14   :  { %s28_s24 = sshll.u32 %s380_s23, 4  ;;  %p328_p8 = scmp.ne.s32.totalorder %s437_s1, %s327_s27  ;;  %s29_s24 = int_to_ptr.vmem [resolvable:$true] %s28_s24 }
  0x15   :  { %p331_p9 = scmp.lt.u32.totalorder %s327_s27, %s437_s1 }
  0x17   :  { %p333_p10 = pnand %p331_p9, %p328_p8 }
  0x19   :  { %336 = shalt.err (!%p333_p10)
}
  0x1a   :  { %s337_s4 = scalar_lea.vmem %s29_s24, 128  ;;  %p342_p12 = scmp.lt.s32.totalorder %s29_s24, %s29_s24 }
  0x1b   :  { %p338_p11 = scmp.ne.s32.totalorder %s29_s24, %s337_s4  ;;  %p343_p13 = scmp.lt.s32.totalorder %s337_s4, %s337_s4 }
  0x1d   :  { %p344_p0 = por %p343_p13, %p342_p12 }
  0x1f   :  { %p345_p1 = pnand %p344_p0, %p338_p11 }
  0x21   :  { %348 = shalt.err (!%p345_p1)
}
  0x22   :  { %31 = dma.hbm_to_vmem [thread:$0]  %s437_s1, 128, %s29_s24, [#allocation6]  }
  0x23   :  { %371 = dma.done.wait [#allocation3], 2560  }
  0x24   :  { %372 = vsyncadd [#allocation3], 4294964736 }
  0x25   :  { %373 = dma.done.wait [#allocation6], 128  }
  0x26   :  { %374 = vsyncadd [#allocation6], 4294967168  ;;  %v381_v0 = vmov 0.0   ;;  %v40_v1 = vld [vmem:[#allocation2 + $0x8] sm:$0xff]  ;;  %v39_v3 = vld [vmem:[#allocation2] sm:$0xff]  ;;  %vm59_vm0 = vcmask 326656  }
  0x27   :  { %127 = vmatprep.mubr.f32.mxu0 %v381_v0  ;;  %198 = vmatprep.mubr.f32.mxu1 %v381_v0  ;;  %v44_v2 = vld [vmem:[#allocation2 + $0x28] sm:$0xff]  ;;  %v43_v5 = vld [vmem:[#allocation2 + $0x20] sm:$0xff]  ;;  %v42_v6 = vld [vmem:[#allocation2 + $0x18] sm:$0xff]  ;;  %v382_v50 = vmov 40   ;;  %v383_v51 = vmov 41   ;;  %s384_s1 = smov [#allocation7]  }
  0x28   :  { %v276_v4 = vpack.c.bf16 %v44_v2, %v40_v1  ;;  %v46_v7 = vld [vmem:[#allocation2 + $0x38] sm:$0xff]  ;;  %v278_v8 = vpack.c.bf16 %v43_v5, %v39_v3  ;;  %v41_v10 = vld [vmem:[#allocation2 + $0x10] sm:$0xff]  ;;  %v48_v12 = vld [vmem:[#allocation2 + $0x48] sm:$0xff]  ;;  %300 = vset.pattern.permute.xlu1 %v382_v50  ;;  %302 = vset.pattern.permute.xlu0 %v383_v51  ;;  %s264_s6 = sshll.u32 %s384_s1, 4  ;;  %s265_s6 = int_to_ptr.vmem [resolvable:$true] %s264_s6 }
  0x29   :  { %v284_v9 = vpack.c.bf16 %v46_v7, %v42_v6  ;;  %v45_v11 = vld [vmem:[#allocation2 + $0x30] sm:$0xff]  ;;  %v52_v14 = vld [vmem:[#allocation2 + $0x68] sm:$0xff]  ;;  %v47_v15 = vld [vmem:[#allocation2 + $0x40] sm:$0xff]  ;;  %s349_s7 = scalar_lea.vmem %s265_s6, 512  ;;  %p354_p3 = scmp.lt.s32.totalorder %s265_s6, %s265_s6 }
  0x2a   :  { %277 = vmatprep.subr.bf16.mxu0 %v276_v4  ;;  %v286_v13 = vpack.c.bf16 %v45_v11, %v41_v10  ;;  %v51_v16 = vld [vmem:[#allocation2 + $0x60] sm:$0xff]  ;;  %v280_v17 = vpack.c.bf16 %v52_v14, %v48_v12  ;;  %v50_v19 = vld [vmem:[#allocation2 + $0x58] sm:$0xff]  ;;  %v49_v21 = vld [vmem:[#allocation2 + $0x50] sm:$0xff]  ;;  %p350_p2 = scmp.ne.s32.totalorder %s265_s6, %s349_s7  ;;  %p355_p4 = scmp.lt.s32.totalorder %s349_s7, %s349_s7 }
  0x2b   :  { %279 = vmatpush1.bf16.msra.mxu0 %v278_v8  ;;  %285 = vmatprep.subr.bf16.mxu1 %v284_v9  ;;  %v282_v18 = vpack.c.bf16 %v51_v16, %v47_v15  ;;  %v54_v20 = vld [vmem:[#allocation2 + $0x78] sm:$0xff]  ;;  %v53_v23 = vld [vmem:[#allocation2 + $0x70] sm:$0xff]  ;;  %v56_v25 = vld [vmem:[#allocation2 + $0x88] sm:$0xff] }
  0x2c   :  { %287 = vmatpush1.bf16.msra.mxu1 %v286_v13  ;;  %v288_v22 = vpack.c.bf16 %v54_v20, %v50_v19  ;;  %281 = vmatprep.subr.bf16.mxu0 %v280_v17  ;;  %v290_v24 = vpack.c.bf16 %v53_v23, %v49_v21  ;;  %v58_v26 = vld [vmem:[#allocation2 + $0x98] sm:$0xff]  ;;  %v55_v27 = vld [vmem:[#allocation2 + $0x80] sm:$0xff]  ;;  %v57_v29 = vld [vmem:[#allocation2 + $0x90] sm:$0xff]  ;;  %p356_p5 = por %p355_p4, %p354_p3 }
  0x2d   :  { %v38_v28 = vld [vmem:[#allocation5] sm:$0xff] }
  0x2e   :  { %289 = vmatprep.subr.bf16.mxu1 %v288_v22  ;;  %p357_p6 = pnand %p356_p5, %p350_p2 }
  0x2f   :  { %283 = vmatpush1.bf16.msra.mxu0 %v282_v18 }
  0x30   :  { %291 = vmatpush1.bf16.msra.mxu1 %v290_v24  ;;  %71 = vmatprep.subr.mxu0 %v56_v25 }
  0x31   :  { %142 = vmatprep.subr.mxu1 %v58_v26 }
  0x33   :  { %72 = vmatpush1.msra.mxu0 %v55_v27 }
  0x34   :  { %274 = vmatmul.mubr.msk.f32.vlgmr.msra.gmra.mrb[0].mxu0 %vm59_vm0, %v38_v28  ;;  %143 = vmatpush1.msra.mxu1 %v57_v29 }
  0x35   :  { %275 = vmatmul.mubr.msk.f32.vlgmr.msra.gmra.mrb[0].mxu1 %vm59_vm0, %v38_v28 }
 0x107   :  { %v129_v30 = vpop.f32.mrb[0].mxu0 }
 0x108   :  { %v131_v31 = vpop.f32.mrb[1].mxu0  ;;  %v200_v32 = vpop.f32.mrb[0].mxu1 }
 0x109   :  { %v205_v33 = vadd.f32 %v131_v31, %v129_v30  ;;  %v202_v34 = vpop.f32.mrb[1].mxu1 }
 0x10b   :  { %v206_v35 = vadd.f32 %v205_v33, %v200_v32 }
 0x10d   :  { %v207_v36 = vadd.f32 %v206_v35, %v202_v34 }
 0x10f   :  { %208 = vadd.xlane.f32.xlu0 %v207_v36 }
 0x19c   :  { %v209_v37 = vpop.xlane.xlu0 %208 }
 0x19d   :  { %v211_v38 = vmul.f32 0.001953125, %v209_v37 }
 0x19f   :  { %v212_v39 = vsub.f32 %v129_v30, %v211_v38  ;;  %v213_v40 = vsub.f32 %v131_v31, %v211_v38  ;;  %v214_v41 = vsub.f32 %v200_v32, %v211_v38  ;;  %v215_v42 = vsub.f32 %v202_v34, %v211_v38 }
 0x1a1   :  { %v216_v43 = vmul.f32 %v212_v39, %v212_v39  ;;  %v217_v44 = vmul.f32 %v213_v40, %v213_v40  ;;  %v218_v45 = vmul.f32 %v214_v41, %v214_v41  ;;  %v219_v47 = vmul.f32 %v215_v42, %v215_v42 }
 0x1a3   :  { %v220_v46 = vadd.f32 %v217_v44, %v216_v43 }
 0x1a5   :  { %v221_v48 = vadd.f32 %v220_v46, %v218_v45 }
 0x1a7   :  { %v222_v49 = vadd.f32 %v221_v48, %v219_v47 }
 0x1a9   :  { %223 = vadd.xlane.f32.xlu0 %v222_v49 }
 0x236   :  { %v224_v52 = vpop.xlane.xlu0 %223 }
 0x237   :  { %v225_v53 = vmul.f32 0.001953125, %v224_v52 }
 0x239   :  { %v226_v54 = vadd.f32 1e-05, %v225_v53 }
 0x23b   :  { %303 = vrsqrt.f32 %v226_v54 }
 0x245   :  { %v304_v55 = vpop.eup %303 }
 0x246   :  { %v228_v56 = vmul.f32 %v304_v55, %v38_v28 }
 0x248   :  { %231 = vperm.xlu1 %300, %v228_v56  }
 0x24c   :  { %301 = vset.pattern.permute.xlu1 %v383_v51 }
 0x24d   :  { %239 = vperm.xlu1 %301, %v38_v28  }
 0x2c7   :  { %v232_v57 = vpop.permute.xlu1 %231 }
 0x2c8   :  { %v234_v58 = vmul.f32 %v232_v57, %v212_v39  ;;  %v235_v59 = vmul.f32 %v232_v57, %v213_v40  ;;  %v236_v60 = vmul.f32 %v232_v57, %v214_v41  ;;  %v237_v61 = vmul.f32 %v232_v57, %v215_v42 }
 0x2cc   :  { %v240_v62 = vpop.permute.xlu1 %239 }
 0x2cd   :  { %v242_v63 = vadd.f32 %v240_v62, %v234_v58  ;;  %v243_v0 = vadd.f32 %v240_v62, %v235_v59  ;;  %v244_v1 = vadd.f32 %v240_v62, %v236_v60  ;;  %v245_v2 = vadd.f32 %v240_v62, %v237_v61 }
 0x2cf   :  { %v246_v3 = vmul.f32 0.1, %v242_v63  ;;  %v247_v4 = vmul.f32 0.1, %v243_v0  ;;  %v248_v5 = vmul.f32 0.1, %v244_v1 }
 0x2d0   :  { %v249_v6 = vmul.f32 0.1, %v245_v2 }
 0x2d1   :  { %v250_v7 = vmax.f32 %v242_v63, %v246_v3  ;;  %v251_v8 = vmax.f32 %v243_v0, %v247_v4  ;;  %v252_v9 = vmax.f32 %v244_v1, %v248_v5 }
 0x2d2   :  { %v253_v10 = vmax.f32 %v245_v2, %v249_v6 }
 0x2d3   :  { %254 = vst [vmem:[#allocation7] sm:$0xff] %v250_v7  ;;  %255 = vst [vmem:[#allocation7 + $0x8] sm:$0xff] %v251_v8 }
 0x2d4   :  { %256 = vst [vmem:[#allocation7 + $0x10] sm:$0xff] %v252_v9  ;;  %257 = vst [vmem:[#allocation7 + $0x18] sm:$0xff] %v253_v10 }
 0x2d5   :  { %360 = shalt.err (!%p357_p6)
}
 0x2d6   :  { %s361_s10 = scalar_lea.hbm %s438_s2, 512 }
 0x2d7   :  { %p362_p7 = scmp.ne.s32.totalorder %s438_s2, %s361_s10  ;;  %p365_p8 = scmp.lt.u32.totalorder %s361_s10, %s438_s2 }
 0x2d9   :  { %p367_p9 = pnand %p365_p8, %p362_p7 }
 0x2db   :  { %370 = shalt.err (!%p367_p9)
}
 0x2dc   :  { %267 = dma.vmem_to_hbm [thread:$0]  %s265_s6, 512, %s438_s2, [#allocation4]  }
 0x2dd   :  { %375 = dma.done.wait [#allocation4], 512  }
 0x2de   :  { %376 = vsyncadd [#allocation4], 4294966784 }
 0x2df   :  { %271 = vsyncpa [#allocation3], 1 }
 0x2e0   :  { %272 = vsyncpa [#allocation6], 1 }
 0x2e1   :  { %273 = vsyncpa [#allocation4], 1 }

</bundles_post_ra>
